<compile_context>
chip_gen: v7x
topology: tpu7x:2x2x1
jax: 0.10.0
libtpu: 0.0.40
codegen_flags: <defaults>
</compile_context>

<pallas_src>
import jax
import jax.numpy as jnp
from jax.experimental import pallas as pl
from jax.experimental.pallas import tpu as pltpu

MAX_LEN = 25
LANE_PAD = 128   # lane-dense packed-output width (scores | loss | zero pad)


def fm_kernel(sess_ref, item_ref, wcat_ref, bq_ref, sel_ref, lbl_ref, out_ref):
    sess = sess_ref[...]                       # (tB, S)
    item = item_ref[...]                       # (tB, L*D)  lane-dense flat item block
    tB, LD = item.shape
    L = MAX_LEN

    # ---- one MXU matmul against the pre-tiled folded weight [tile_L(Q@P^T) | b_p | 0..] ----
    sb = jnp.dot(sess, wcat_ref[...], preferred_element_type=jnp.float32)   # (tB, 512)
    w_tiled = sb[:, :LD] + bq_ref[...]         # (tB, L*D): ((sess@Q@P^T)[:,d] + b_q[d]), tiled L times
    bias_s = sb[:, LD:LD + 1]                  # (tB, 1): sess @ b_p

    # ---- per-candidate segment reduce on the MXU via constant 0/1 selection matrix ----
    sdense = jnp.dot(item * w_tiled, sel_ref[...],
                     preferred_element_type=jnp.float32)                    # (tB, 128)
    scores = sdense[:, :L] + bias_s                                          # (tB, L)

    # ---- BPR loss, per row (batch mean finished in XLA; no cross-grid accumulator) ----
    lbl = lbl_ref[...]                                                       # (tB, 1) int32
    pos_mask = jax.lax.broadcasted_iota(jnp.int32, (tB, L), 1) == lbl        # (tB, L)
    positive = jnp.sum(jnp.where(pos_mask, scores, 0.0),
                       axis=1, keepdims=True)                                # (tB, 1)
    subtracts = positive - scores                                            # (tB, L)
    # Kept bit-compatible with the reference: -mean(log(sigmoid(x) + 1e-6), dim=1).
    per_row = -jnp.mean(jnp.log(jax.nn.sigmoid(subtracts) + 1e-6),
                        axis=1, keepdims=True)                               # (tB, 1)

    # ---- single lane-dense (tB, 128) store: [scores | per-row loss | zeros] ----
    pad = jnp.zeros((tB, LANE_PAD - L - 1), jnp.float32)
    out_ref[...] = jnp.concatenate([scores, per_row, pad], axis=1)


def xavier_normal(key, shape):
    fan_in, fan_out = shape
    std = (2.0 / (fan_in + fan_out)) ** 0.5
    return (std * jax.random.normal(key, shape)).astype(jnp.float32)


def init_fm_params(key, config, item_dim, sess_dim):
    kq, kp, kbp, kbq = jax.random.split(key, 4)
    return {
        "Q": xavier_normal(kq, (sess_dim, config["hidden_dim"])),
        "P": xavier_normal(kp, (item_dim, config["hidden_dim"])),
        "b_p": xavier_normal(kbp, (sess_dim, 1)),
        "b_q": xavier_normal(kbq, (item_dim, 1)),
    }


def compute_label_idx(labels, item_idx):
    # Host-side string matching, identical semantics to FM.label_idx.
    # TODO(synk): python string list.index has no Pallas equivalent; stays on host.
    out = []
    for i in range(len(labels)):
        label = str(labels[i])
        try:
            out.append(item_idx[i].index(label))
        except ValueError:
            out.append(0)
    return out


def _round_up(x, m):
    return (x + m - 1) // m * m


def fm_forward(params, sess_vectors, item_vectors, labels, item_idx,
               loss_type="bpr", tile_b=2048):
    if loss_type != "bpr":
        # TODO(synk): 'top1' and 'test' loss branches not ported (only default 'bpr' path).
        raise NotImplementedError
    B, S = sess_vectors.shape
    _, L, D = item_vectors.shape
    LD = L * D

    lbl = jnp.asarray(compute_label_idx(labels, item_idx),
                      dtype=jnp.int32).reshape(B, 1)

    # ---- Fold batch-independent parameter math once (wrapper, XLA) ----
    # wcat = [ tile_L(Q @ P^T) | b_p | zero pad ]  ->  (S, WCAT_W), WCAT_W multiple of 128,
    # so the in-kernel sess matmul yields a full-width, unmasked MXU result slab.
    qpt = params["Q"] @ params["P"].T                                  # (S, D)
    wcat_w = _round_up(LD + 1, 128)                                    # 512 for L=25, D=16
    wcat = jnp.concatenate(
        [jnp.tile(qpt, (1, L)), params["b_p"],
         jnp.zeros((S, wcat_w - LD - 1), jnp.float32)], axis=1)        # (S, WCAT_W)
    bq_tiled = jnp.tile(params["b_q"].T, (1, L))                       # (1, L*D)
    # Constant 0/1 block-diagonal selection matrix: sums each contiguous D-lane segment of
    # the flat item*weight product into scores[:, l] on the MXU (lane-dense (tb, 128) result).
    sel = (jnp.arange(LD)[:, None] // D ==
           jnp.arange(LANE_PAD)[None, :]).astype(jnp.float32)          # (L*D, 128)

    # ---- Batch tiling ----
    # Flat (tb, 400) item blocks: ~1.6 KiB/row -> ~3.2 MiB/buffer at tb=2048; with double
    # buffering of item/out/sess/lbl the total is ~15 MiB, safe on v5e/v6e/v7x.
    tb = min(_round_up(B, 8), tile_b)
    if B > 8:
        # v7x has 2 TensorCores: keep >=2 grid tiles so the "parallel" batch axis shards.
        tb = min(tb, _round_up(-(-B // 2), 8))
    b_pad = _round_up(B, tb)
    n_tiles = b_pad // tb

    def pad_rows(x):
        return jnp.pad(x, ((0, b_pad - B),) + ((0, 0),) * (x.ndim - 1))

    sess_p = pad_rows(sess_vectors)
    item_p = pad_rows(item_vectors.reshape(B, LD))   # free reshape of contiguous HBM
    lbl_p = pad_rows(lbl)

    out = pl.pallas_call(
        fm_kernel,
        out_shape=jax.ShapeDtypeStruct((b_pad, LANE_PAD), jnp.float32),
        grid_spec=pltpu.PrefetchScalarGridSpec(
            num_scalar_prefetch=0,
            grid=(n_tiles,),
            in_specs=[
                pl.BlockSpec((tb, S), lambda i: (i, 0)),          # sess tile
                pl.BlockSpec((tb, LD), lambda i: (i, 0)),         # flat item tile (lane-dense)
                pl.BlockSpec((S, wcat_w), lambda i: (0, 0)),      # resident [tile_L(Q@P^T)|b_p|0]
                pl.BlockSpec((1, LD), lambda i: (0, 0)),          # resident tiled b_q^T
                pl.BlockSpec((LD, LANE_PAD), lambda i: (0, 0)),   # resident selection matrix
                pl.BlockSpec((tb, 1), lambda i: (i, 0)),          # label idx tile
            ],
            out_specs=pl.BlockSpec((tb, LANE_PAD), lambda i: (i, 0)),
        ),
        compiler_params=pltpu.CompilerParams(
            dimension_semantics=("parallel",),   # no accumulator -> megacore-shardable (v7x)
            vmem_limit_bytes=48 * 1024 * 1024,   # headroom for tile_b up to ~4096 (v5e/v6e)
        ),
    )(sess_p, item_p, wcat, bq_tiled, sel, lbl_p)

    scores = out[:B, :L]                        # (B, max_len)
    loss = jnp.mean(out[:B, L])                 # batch mean finished in XLA
    return scores, loss


def fm_reference(params, sess_vectors, item_vectors, label_idx):
    # Pure-JAX transliteration of the torch module (for a loose sanity check).
    SQ = sess_vectors @ params["Q"]                                   # (B, H)
    IP = jnp.swapaxes(item_vectors @ params["P"], 1, 2)               # (B, H, L)
    s = jnp.squeeze(SQ[:, None, :] @ IP, axis=1)                      # (B, L)
    scores = (s + (sess_vectors @ params["b_p"])
              + jnp.squeeze(item_vectors @ params["b_q"], axis=2))    # (B, L)
    B = scores.shape[0]
    pos = scores[jnp.arange(B), jnp.asarray(label_idx)][:, None]
    loss = jnp.mean(-jnp.mean(jnp.log(jax.nn.sigmoid(pos - scores) + 1e-6), axis=1))
    return scores, loss


if __name__ == "__main__":
    config = {"hidden_dim": 32}
    item_dim, sess_dim = 16, 32
    B = 8

    key = jax.random.PRNGKey(0)
    kparam, ksess, kitem = jax.random.split(key, 3)
    params = init_fm_params(kparam, config, item_dim, sess_dim)

    sess_vectors = jax.random.normal(ksess, (B, sess_dim), dtype=jnp.float32)
    item_vectors = jax.random.normal(kitem, (B, MAX_LEN, item_dim), dtype=jnp.float32)

    # synthetic string item ids / labels (mirrors the torch module's raw inputs)
    item_idx = [[str(100 * i + j) for j in range(MAX_LEN)] for i in range(B)]
    labels = [item_idx[i][(3 * i) % MAX_LEN] if i % 2 == 0 else "missing"
              for i in range(B)]

    scores, loss = fm_forward(params, sess_vectors, item_vectors, labels,
                              item_idx, loss_type="bpr")
    jax.block_until_ready((scores, loss))

    assert scores.shape == (B, MAX_LEN)
    assert loss.shape == ()
    assert bool(jnp.all(jnp.isfinite(scores))) and bool(jnp.isfinite(loss))

    # Loose sanity check vs. a pure-JAX transliteration of the torch math
    # (loose tolerance: MXU f32 matmuls may use multi-pass bf16 accumulation).
    ref_scores, ref_loss = fm_reference(
        params, sess_vectors, item_vectors, compute_label_idx(labels, item_idx))
    assert jnp.allclose(scores, ref_scores, rtol=5e-2, atol=5e-2)
    assert jnp.allclose(loss, ref_loss, rtol=5e-2, atol=5e-2)

    print("KERNEL_OK")
</pallas_src>

<mosaic_0001>
module attributes {stable_mosaic.version = 11 : i64} {
  func.func @fm_kernel(%arg0: i32, %arg1: memref<8x32xf32, #tpu.memory_space<vmem>>, %arg2: memref<8x400xf32, #tpu.memory_space<vmem>>, %arg3: memref<32x512xf32, #tpu.memory_space<vmem>>, %arg4: memref<1x400xf32, #tpu.memory_space<vmem>>, %arg5: memref<400x128xf32, #tpu.memory_space<vmem>>, %arg6: memref<8x1xi32, #tpu.memory_space<vmem>>, %arg7: memref<8x128xf32, #tpu.memory_space<vmem>>) attributes {dimension_semantics = [#tpu.dimension_semantics<parallel>], iteration_bounds = array<i64: 1>, scalar_prefetch = 0 : i64, scratch_operands = 0 : i64, tpu.core_type = #tpu.core_type<tc>, window_params = [{transform_indices = @transform_0, window_bounds = array<i64: 8, 32>}, {transform_indices = @transform_1, window_bounds = array<i64: 8, 400>}, {pipeline_mode = #tpu.pipeline_mode<synchronous>, transform_indices = @transform_2, window_bounds = array<i64: 32, 512>}, {pipeline_mode = #tpu.pipeline_mode<synchronous>, transform_indices = @transform_3, window_bounds = array<i64: 1, 400>}, {pipeline_mode = #tpu.pipeline_mode<synchronous>, transform_indices = @transform_4, window_bounds = array<i64: 400, 128>}, {transform_indices = @transform_5, window_bounds = array<i64: 8, 1>}, {transform_indices = @transform_6, window_bounds = array<i64: 8, 128>}]} {
    %c0 = arith.constant 0 : index
    %c0_0 = arith.constant 0 : index
    %0 = vector.load %arg1[%c0, %c0_0] : memref<8x32xf32, #tpu.memory_space<vmem>>, vector<8x32xf32>
    %c0_1 = arith.constant 0 : index
    %c0_2 = arith.constant 0 : index
    %1 = vector.load %arg2[%c0_1, %c0_2] : memref<8x400xf32, #tpu.memory_space<vmem>>, vector<8x400xf32>
    %c0_3 = arith.constant 0 : index
    %c0_4 = arith.constant 0 : index
    %2 = vector.load %arg3[%c0_3, %c0_4] : memref<32x512xf32, #tpu.memory_space<vmem>>, vector<32x512xf32>
    %cst = arith.constant dense<0.000000e+00> : vector<8x512xf32>
    %3 = tpu.matmul %0, %2, %cst {dimension_numbers = #tpu.dot_dimension_numbers<[1], [0], [0], [1], [0, 0, 1, 1], [], []>} : vector<8x32xf32>, vector<32x512xf32>, vector<8x512xf32> -> vector<8x512xf32>
    %4 = vector.extract_strided_slice %3 {offsets = [0, 0], sizes = [8, 400], strides = [1, 1]} : vector<8x512xf32> to vector<8x400xf32>
    %c0_5 = arith.constant 0 : index
    %c0_6 = arith.constant 0 : index
    %5 = vector.load %arg4[%c0_5, %c0_6] : memref<1x400xf32, #tpu.memory_space<vmem>>, vector<1x400xf32>
    %6 = vector.broadcast %5 : vector<1x400xf32> to vector<8x400xf32>
    %7 = arith.addf %4, %6 : vector<8x400xf32>
    %8 = vector.extract_strided_slice %3 {offsets = [0, 400], sizes = [8, 1], strides = [1, 1]} : vector<8x512xf32> to vector<8x1xf32>
    %9 = arith.mulf %1, %7 : vector<8x400xf32>
    %c0_7 = arith.constant 0 : index
    %c0_8 = arith.constant 0 : index
    %10 = vector.load %arg5[%c0_7, %c0_8] : memref<400x128xf32, #tpu.memory_space<vmem>>, vector<400x128xf32>
    %cst_9 = arith.constant dense<0.000000e+00> : vector<8x128xf32>
    %11 = tpu.matmul %9, %10, %cst_9 {dimension_numbers = #tpu.dot_dimension_numbers<[1], [0], [0], [1], [0, 0, 1, 1], [], []>} : vector<8x400xf32>, vector<400x128xf32>, vector<8x128xf32> -> vector<8x128xf32>
    %12 = vector.extract_strided_slice %11 {offsets = [0, 0], sizes = [8, 25], strides = [1, 1]} : vector<8x128xf32> to vector<8x25xf32>
    %13 = vector.broadcast %8 : vector<8x1xf32> to vector<8x25xf32>
    %14 = arith.addf %12, %13 : vector<8x25xf32>
    %c0_10 = arith.constant 0 : index
    %c0_11 = arith.constant 0 : index
    %15 = vector.load %arg6[%c0_10, %c0_11] : memref<8x1xi32, #tpu.memory_space<vmem>>, vector<8x1xi32>
    %16 = tpu.iota {dimensions = array<i32: 1>} : vector<8x25xi32>
    %17 = vector.broadcast %15 : vector<8x1xi32> to vector<8x25xi32>
    %18 = arith.cmpi eq, %16, %17 : vector<8x25xi32>
    %cst_12 = arith.constant 0.000000e+00 : f32
    %19 = vector.broadcast %cst_12 : f32 to vector<8x25xf32>
    %20 = arith.select %18, %14, %19 : vector<8x25xi1>, vector<8x25xf32>
    %cst_13 = arith.constant dense<0.000000e+00> : vector<8xf32>
    %21 = vector.multi_reduction <add>, %20, %cst_13 [1] : vector<8x25xf32> to vector<8xf32>
    %22 = vector.shape_cast %21 : vector<8xf32> to vector<8x1xf32>
    %23 = vector.broadcast %22 : vector<8x1xf32> to vector<8x25xf32>
    %24 = arith.subf %23, %14 : vector<8x25xf32>
    %25 = arith.negf %24 : vector<8x25xf32>
    %26 = math.exp %25 : vector<8x25xf32>
    %cst_14 = arith.constant 1.000000e+00 : f32
    %27 = vector.broadcast %cst_14 : f32 to vector<8x25xf32>
    %28 = arith.addf %27, %26 : vector<8x25xf32>
    %29 = arith.divf %27, %28 : vector<8x25xf32>
    %cst_15 = arith.constant 9.99999997E-7 : f32
    %30 = vector.broadcast %cst_15 : f32 to vector<8x25xf32>
    %31 = arith.addf %29, %30 : vector<8x25xf32>
    %32 = math.log %31 : vector<8x25xf32>
    %cst_16 = arith.constant dense<0.000000e+00> : vector<8xf32>
    %33 = vector.multi_reduction <add>, %32, %cst_16 [1] : vector<8x25xf32> to vector<8xf32>
    %34 = vector.shape_cast %33 : vector<8xf32> to vector<8x1xf32>
    %cst_17 = arith.constant 2.500000e+01 : f32
    %35 = vector.broadcast %cst_17 : f32 to vector<8x1xf32>
    %36 = arith.divf %34, %35 : vector<8x1xf32>
    %cst_18 = arith.constant 0.000000e+00 : f32
    %37 = vector.broadcast %cst_18 : f32 to vector<8x1xf32>
    %38 = arith.subf %37, %36 : vector<8x1xf32>
    %cst_19 = arith.constant 0.000000e+00 : f32
    %39 = vector.broadcast %cst_19 : f32 to vector<8x102xf32>
    %40 = tpu.concatenate %14, %38, %39 in 1 : vector<8x25xf32>, vector<8x1xf32>, vector<8x102xf32> -> vector<8x128xf32>
    %c0_20 = arith.constant 0 : index
    %c0_21 = arith.constant 0 : index
    %41 = vector.load %arg7[%c0_20, %c0_21] : memref<8x128xf32, #tpu.memory_space<vmem>>, vector<8x128xf32>
    tpu.vector_store %arg7[%c0_20, %c0_21], %40 {strides = array<i32>} : memref<8x128xf32, #tpu.memory_space<vmem>>, vector<8x128xf32>,
    return
  }
  func.func @transform_0(%arg0: i32) -> (i32, i32) {
    %c0_i32 = arith.constant 0 : i32
    %c0_i32_0 = arith.constant 0 : i32
    return %arg0, %c0_i32 : i32, i32
  }
  func.func @transform_1(%arg0: i32) -> (i32, i32) {
    %c0_i32 = arith.constant 0 : i32
    %c0_i32_0 = arith.constant 0 : i32
    return %arg0, %c0_i32 : i32, i32
  }
  func.func @transform_2(%arg0: i32) -> (i32, i32) {
    %c0_i32 = arith.constant 0 : i32
    %c0_i32_0 = arith.constant 0 : i32
    %c0_i32_1 = arith.constant 0 : i32
    return %c0_i32, %c0_i32_0 : i32, i32
  }
  func.func @transform_3(%arg0: i32) -> (i32, i32) {
    %c0_i32 = arith.constant 0 : i32
    %c0_i32_0 = arith.constant 0 : i32
    %c0_i32_1 = arith.constant 0 : i32
    return %c0_i32, %c0_i32_0 : i32, i32
  }
  func.func @transform_4(%arg0: i32) -> (i32, i32) {
    %c0_i32 = arith.constant 0 : i32
    %c0_i32_0 = arith.constant 0 : i32
    %c0_i32_1 = arith.constant 0 : i32
    return %c0_i32, %c0_i32_0 : i32, i32
  }
  func.func @transform_5(%arg0: i32) -> (i32, i32) {
    %c0_i32 = arith.constant 0 : i32
    %c0_i32_0 = arith.constant 0 : i32
    return %arg0, %c0_i32 : i32, i32
  }
  func.func @transform_6(%arg0: i32) -> (i32, i32) {
    %c0_i32 = arith.constant 0 : i32
    %c0_i32_0 = arith.constant 0 : i32
    return %arg0, %c0_i32 : i32, i32
  }
}

</mosaic_0001>

<bundles_post_ra>
// kernel: tpu_custom_call.1
= control target key start
LH: loop header
LB: loop body
LE: loop exit
PB: predicated region body
PF: predicated region fallthrough
CT: control target
= control target key end

     0   :  { %11 = vsyncpa [#allocation3], 0  ;;  %s854_s0 = inlined_call_operand.vmem [shape: f32[8,32], index: 0, kind: input, shape index: {}]   ;;  %s855_s1 = inlined_call_operand.hbm [shape: f32[8,400], index: 1, kind: input, shape index: {}]   ;;  %s856_s2 = inlined_call_operand.hbm [shape: f32[32,512], index: 2, kind: input, shape index: {}]   ;;  %s857_s3 = inlined_call_operand.vmem [shape: f32[1,400], index: 3, kind: input, shape index: {}]   ;;  %s858_s4 = inlined_call_operand.hbm [shape: f32[400,128], index: 4, kind: input, shape index: {}]   ;;  %s859_s5 = inlined_call_operand.vmem [shape: s32[8,1], index: 5, kind: input, shape index: {}]   ;;  %s860_s6 = inlined_call_operand.hbm [shape: f32[8,128], index: 6, kind: output, shape index: {}]  }
   0x1   :  { %12 = vsyncpa [#allocation6], 0 }
   0x2   :  { %13 = vsyncpa [#allocation4], 0  ;;  %s736_s21 = smov [#allocation5]   ;;  %s642_s25 = scalar_lea.hbm %s856_s2, 2048 }
   0x3   :  { %s31_s22 = sshll.u32 %s736_s21, 4  ;;  %p643_p0 = scmp.ne.s32.totalorder %s856_s2, %s642_s25  ;;  %s32_s22 = int_to_ptr.vmem [resolvable:$true] %s31_s22 }
   0x4   :  { %p646_p1 = scmp.lt.u32.totalorder %s642_s25, %s856_s2 }
   0x6   :  { %p648_p2 = pnand %p646_p1, %p643_p0 }
   0x8   :  { %651 = shalt.err (!%p648_p2)
}
   0x9   :  { %s652_s30 = scalar_lea.vmem %s32_s22, 2048  ;;  %p657_p4 = scmp.lt.s32.totalorder %s32_s22, %s32_s22 }
   0xa   :  { %p653_p3 = scmp.ne.s32.totalorder %s32_s22, %s652_s30  ;;  %p658_p5 = scmp.lt.s32.totalorder %s652_s30, %s652_s30 }
   0xc   :  { %p659_p6 = por %p658_p5, %p657_p4 }
   0xe   :  { %p660_p7 = pnand %p659_p6, %p653_p3 }
  0x10   :  { %663 = shalt.err (!%p660_p7)
}
  0x11   :  { %s737_s7 = smov 512   ;;  %s738_s8 = smov 32  }
  0x12   :  { %37 = dma.hbm_to_vmem [thread:$0]  %s856_s2, 2048, %s32_s22, [#allocation6], %s737_s7, %s737_s7, %s738_s8  }
  0x13   :  { %s739_s11 = smov [#allocation2]   ;;  %s740_s13 = smov [#allocation7]  }
  0x14   :  { %s22_s12 = sshll.u32 %s739_s11, 4  ;;  %s45_s14 = sshll.u32 %s740_s13, 4  ;;  %s23_s12 = int_to_ptr.vmem [resolvable:$true] %s22_s12  ;;  %s46_s14 = int_to_ptr.vmem [resolvable:$true] %s45_s14 }
  0x15   :  { %s664_s17 = scalar_lea.hbm %s855_s1, 512 }
  0x16   :  { %p665_p8 = scmp.ne.s32.totalorder %s855_s1, %s664_s17  ;;  %p668_p9 = scmp.lt.u32.totalorder %s664_s17, %s855_s1 }
  0x18   :  { %p670_p10 = pnand %p668_p9, %p665_p8 }
  0x1a   :  { %673 = shalt.err (!%p670_p10)
}
  0x1b   :  { %s674_s2 = scalar_lea.vmem %s23_s12, 512  ;;  %p679_p12 = scmp.lt.s32.totalorder %s23_s12, %s23_s12 }
  0x1c   :  { %p675_p11 = scmp.ne.s32.totalorder %s23_s12, %s674_s2  ;;  %p680_p13 = scmp.lt.s32.totalorder %s674_s2, %s674_s2 }
  0x1e   :  { %p681_p0 = por %p680_p13, %p679_p12 }
  0x20   :  { %p682_p1 = pnand %p681_p0, %p675_p11 }
  0x22   :  { %685 = shalt.err (!%p682_p1)
}
  0x23   :  { %25 = dma.hbm_to_vmem [thread:$0]  %s855_s1, 512, %s23_s12, [#allocation3]  }
  0x24   :  { %s686_s26 = scalar_lea.hbm %s858_s4, 6400 }
  0x25   :  { %p687_p2 = scmp.ne.s32.totalorder %s858_s4, %s686_s26  ;;  %p690_p3 = scmp.lt.u32.totalorder %s686_s26, %s858_s4 }
  0x27   :  { %p692_p4 = pnand %p690_p3, %p687_p2 }
  0x29   :  { %695 = shalt.err (!%p692_p4)
}
  0x2a   :  { %s696_s7 = scalar_lea.vmem %s46_s14, 6400  ;;  %p701_p6 = scmp.lt.s32.totalorder %s46_s14, %s46_s14 }
  0x2b   :  { %p697_p5 = scmp.ne.s32.totalorder %s46_s14, %s696_s7  ;;  %p702_p7 = scmp.lt.s32.totalorder %s696_s7, %s696_s7 }
  0x2d   :  { %p703_p8 = por %p702_p7, %p701_p6 }
  0x2f   :  { %p704_p9 = pnand %p703_p8, %p697_p5 }
  0x31   :  { %707 = shalt.err (!%p704_p9)
}
  0x32   :  { %s741_s1 = smov 128   ;;  %s742_s8 = smov 8  }
  0x33   :  { %51 = dma.hbm_to_vmem [thread:$0]  %s858_s4, 6400, %s46_s14, [#allocation6], %s741_s1, %s741_s1, %s742_s8  }
  0x34   :  { %730 = dma.done.wait [#allocation3], 512  }
  0x35   :  { %731 = vsyncadd [#allocation3], 4294966784 }
  0x36   :  { %732 = dma.done.wait [#allocation6], 8448  }
  0x37   :  { %733 = vsyncadd [#allocation6], 4294958848  ;;  %v743_v0 = vmov 0.0   ;;  %v69_v1 = vld [vmem:[#allocation5 + $0x8] sm:$0xff]  ;;  %v71_v3 = vld [vmem:[#allocation5 + $0x18] sm:$0xff]  ;;  %vm84_vm0 = vcmask 261120  }
  0x38   :  { %152 = vmatprep.mubr.f32.mxu0 %v743_v0  ;;  %223 = vmatprep.mubr.f32.mxu1 %v743_v0  ;;  %v73_v2 = vld [vmem:[#allocation5 + $0x28] sm:$0xff]  ;;  %v75_v5 = vld [vmem:[#allocation5 + $0x38] sm:$0xff]  ;;  %v68_v6 = vld [vmem:[#allocation5] sm:$0xff]  ;;  %v744_v41 = vmov 0.0|0.0   ;;  %vm310_vm1 = vcmask 130048   ;;  %vm468_vm3 = vcmask 203776  }
  0x39   :  { %v547_v4 = vpack.c.bf16 %v73_v2, %v69_v1  ;;  %v72_v7 = vld [vmem:[#allocation5 + $0x20] sm:$0xff]  ;;  %v555_v8 = vpack.c.bf16 %v75_v5, %v71_v3  ;;  %v70_v10 = vld [vmem:[#allocation5 + $0x10] sm:$0xff]  ;;  %v77_v12 = vld [vmem:[#allocation5 + $0x48] sm:$0xff]  ;;  %vm489_vm4 = vcmask 211968  }
  0x3a   :  { %v549_v9 = vpack.c.bf16 %v72_v7, %v68_v6  ;;  %v74_v11 = vld [vmem:[#allocation5 + $0x30] sm:$0xff]  ;;  %v81_v14 = vld [vmem:[#allocation5 + $0x68] sm:$0xff]  ;;  %v79_v15 = vld [vmem:[#allocation5 + $0x58] sm:$0xff] }
  0x3b   :  { %548 = vmatprep.subr.bf16.mxu0 %v547_v4  ;;  %v557_v13 = vpack.c.bf16 %v74_v11, %v70_v10  ;;  %v83_v16 = vld [vmem:[#allocation5 + $0x78] sm:$0xff]  ;;  %556 = vmatprep.subr.bf16.mxu1 %v555_v8  ;;  %v551_v17 = vpack.c.bf16 %v81_v14, %v77_v12  ;;  %v76_v19 = vld [vmem:[#allocation5 + $0x40] sm:$0xff]  ;;  %v78_v21 = vld [vmem:[#allocation5 + $0x50] sm:$0xff] }
  0x3c   :  { %550 = vmatpush1.bf16.msra.mxu0 %v549_v9  ;;  %v559_v18 = vpack.c.bf16 %v83_v16, %v79_v15  ;;  %v80_v20 = vld [vmem:[#allocation5 + $0x60] sm:$0xff]  ;;  %v82_v23 = vld [vmem:[#allocation5 + $0x70] sm:$0xff]  ;;  %v293_v26 = vld [vmem:[#allocation7 + $0x108] sm:$0xff] }
  0x3d   :  { %558 = vmatpush1.bf16.msra.mxu1 %v557_v13  ;;  %v553_v22 = vpack.c.bf16 %v80_v20, %v76_v19  ;;  %v292_v24 = vld [vmem:[#allocation7 + $0x100] sm:$0xff]  ;;  %552 = vmatprep.subr.bf16.mxu0 %v551_v17  ;;  %v561_v25 = vpack.c.bf16 %v82_v23, %v78_v21  ;;  %v277_v28 = vld [vmem:[#allocation7 + $0x88] sm:$0xff]  ;;  %v278_v34 = vld [vmem:[#allocation7 + $0x90] sm:$0xff] }
  0x3e   :  { %560 = vmatprep.subr.bf16.mxu1 %v559_v18  ;;  %v276_v27 = vld [vmem:[#allocation7 + $0x80] sm:$0xff]  ;;  %v261_v31 = vld [vmem:[#allocation7 + $0x8] sm:$0xff]  ;;  %v279_v35 = vld [vmem:[#allocation7 + $0x98] sm:$0xff]  ;;  %v596_v36 = vpack.c.bf16 %v293_v26, %v292_v24 }
  0x3f   :  { %v563_v29 = vpack.c.bf16 %v277_v28, %v276_v27  ;;  %v260_v30 = vld [vmem:[#allocation7] sm:$0xff]  ;;  %v294_v37 = vld [vmem:[#allocation7 + $0x110] sm:$0xff]  ;;  %v567_v38 = vpack.c.bf16 %v279_v35, %v278_v34  ;;  %v263_v40 = vld [vmem:[#allocation7 + $0x18] sm:$0xff] }
  0x40   :  { %554 = vmatpush1.bf16.msra.mxu0 %v553_v22  ;;  %v63_v32 = vld [vmem:[%s854_s0] sm:$0xff]  ;;  %v565_v33 = vpack.c.bf16 %v261_v31, %v260_v30  ;;  %v262_v39 = vld [vmem:[#allocation7 + $0x10] sm:$0xff]  ;;  %v295_v42 = vld [vmem:[#allocation7 + $0x118] sm:$0xff] }
  0x41   :  { %562 = vmatpush1.bf16.msra.mxu1 %v561_v25  ;;  %564 = vmatprep.subr.bf16.mxu0 %v563_v29  ;;  %v280_v43 = vld [vmem:[#allocation7 + $0xa0] sm:$0xff]  ;;  %v281_v44 = vld [vmem:[#allocation7 + $0xa8] sm:$0xff]  ;;  %v569_v45 = vpack.c.bf16 %v263_v40, %v262_v39  ;;  %v599_v46 = vpack.c.bf16 %v295_v42, %v294_v37  ;;  %v282_v52 = vld [vmem:[#allocation7 + $0xb0] sm:$0xff]  ;;  %v745_v37 = vmov 16   ;;  %v232_v39 = vlaneseq }
  0x42   :  { %595 = vmatprep.subr.bf16.mxu1 %v744_v41  ;;  %v296_v47 = vld [vmem:[#allocation7 + $0x120] sm:$0xff]  ;;  %v571_v48 = vpack.c.bf16 %v281_v44, %v280_v43  ;;  %v265_v50 = vld [vmem:[#allocation7 + $0x28] sm:$0xff]  ;;  %v283_v53 = vld [vmem:[#allocation7 + $0xb8] sm:$0xff]  ;;  %634 = vset.pattern.permute.xlu0 %v745_v37 }
  0x43   :  { %508 = vmatmul.mubr.msk.f32.vlgmr.msra.gmra.mrb[0].mxu0 %vm84_vm0, %v63_v32  ;;  %v264_v49 = vld [vmem:[#allocation7 + $0x20] sm:$0xff]  ;;  %v297_v51 = vld [vmem:[#allocation7 + $0x128] sm:$0xff]  ;;  %v298_v56 = vld [vmem:[#allocation7 + $0x130] sm:$0xff]  ;;  %v575_v57 = vpack.c.bf16 %v283_v53, %v282_v52  ;;  %v233_v40 = vshrl.u32 %v232_v39, 7 }
  0x44   :  { %509 = vmatmul.mubr.msk.f32.vlgmr.msra.gmra.mrb[0].mxu1 %vm84_vm0, %v63_v32  ;;  %566 = vmatpush3.bf16.msra.mxu0 %v565_v33  ;;  %v573_v54 = vpack.c.bf16 %v265_v50, %v264_v49  ;;  %v602_v55 = vpack.c.bf16 %v297_v51, %v296_v47  ;;  %v266_v58 = vld [vmem:[#allocation7 + $0x30] sm:$0xff]  ;;  %v267_v59 = vld [vmem:[#allocation7 + $0x38] sm:$0xff]  ;;  %v284_v61 = vld [vmem:[#allocation7 + $0xc0] sm:$0xff] }
  0x45   :  { %597 = vmatpush1.bf16.msra.mxu1 %v596_v36  ;;  %568 = vmatprep.subr.bf16.mxu0 %v567_v38  ;;  %v299_v60 = vld [vmem:[#allocation7 + $0x138] sm:$0xff]  ;;  %v285_v62 = vld [vmem:[#allocation7 + $0xc8] sm:$0xff]  ;;  %v577_v63 = vpack.c.bf16 %v267_v59, %v266_v58  ;;  %v300_v1 = vld [vmem:[#allocation7 + $0x140] sm:$0xff]  ;;  %v234_v42 = vsub.s32 0, %v233_v40  ;;  %v242_v44 = vsub.s32 2, %v233_v40 }
  0x46   :  { %598 = vmatprep.subr.bf16.mxu1 %v744_v41  ;;  %v605_v0 = vpack.c.bf16 %v299_v60, %v298_v56  ;;  %v579_v2 = vpack.c.bf16 %v285_v62, %v284_v61  ;;  %v268_v3 = vld [vmem:[#allocation7 + $0x40] sm:$0xff]  ;;  %v269_v4 = vld [vmem:[#allocation7 + $0x48] sm:$0xff]  ;;  %v286_v6 = vld [vmem:[#allocation7 + $0xd0] sm:$0xff] }
  0x47   :  { %v301_v5 = vld [vmem:[#allocation7 + $0x148] sm:$0xff]  ;;  %v287_v7 = vld [vmem:[#allocation7 + $0xd8] sm:$0xff]  ;;  %v581_v8 = vpack.c.bf16 %v269_v4, %v268_v3  ;;  %v302_v10 = vld [vmem:[#allocation7 + $0x150] sm:$0xff]  ;;  %v746_v3 = vmov 0  }
  0x48   :  { %570 = vmatpush3.bf16.msra.mxu0 %v569_v45  ;;  %v608_v9 = vpack.c.bf16 %v301_v5, %v300_v1  ;;  %v583_v11 = vpack.c.bf16 %v287_v7, %v286_v6  ;;  %v270_v12 = vld [vmem:[#allocation7 + $0x50] sm:$0xff]  ;;  %v271_v13 = vld [vmem:[#allocation7 + $0x58] sm:$0xff]  ;;  %v288_v15 = vld [vmem:[#allocation7 + $0xe0] sm:$0xff]  ;;  %v238_v45 = vsub.s32 1, %v233_v40 }
  0x49   :  { %600 = vmatpush1.bf16.msra.mxu1 %v599_v46  ;;  %572 = vmatprep.subr.bf16.mxu0 %v571_v48  ;;  %v303_v14 = vld [vmem:[#allocation7 + $0x158] sm:$0xff]  ;;  %v289_v16 = vld [vmem:[#allocation7 + $0xe8] sm:$0xff]  ;;  %v585_v17 = vpack.c.bf16 %v271_v13, %v270_v12  ;;  %v304_v20 = vld [vmem:[#allocation7 + $0x160] sm:$0xff]  ;;  %v246_v46 = vsub.s32 3, %v233_v40 }
  0x4a   :  { %601 = vmatprep.subr.bf16.mxu1 %v744_v41  ;;  %v611_v18 = vpack.c.bf16 %v303_v14, %v302_v10  ;;  %v587_v19 = vpack.c.bf16 %v289_v16, %v288_v15  ;;  %v305_v21 = vld [vmem:[#allocation7 + $0x168] sm:$0xff]  ;;  %v272_v23 = vld [vmem:[#allocation7 + $0x60] sm:$0xff]  ;;  %v306_v25 = vld [vmem:[#allocation7 + $0x170] sm:$0xff] }
  0x4b   :  { %v614_v22 = vpack.c.bf16 %v305_v21, %v304_v20  ;;  %v273_v24 = vld [vmem:[#allocation7 + $0x68] sm:$0xff]  ;;  %v307_v27 = vld [vmem:[#allocation7 + $0x178] sm:$0xff]  ;;  %v290_v29 = vld [vmem:[#allocation7 + $0xf0] sm:$0xff] }
  0x4c   :  { %574 = vmatpush3.bf16.msra.mxu0 %v573_v54  ;;  %v589_v26 = vpack.c.bf16 %v273_v24, %v272_v23  ;;  %v617_v28 = vpack.c.bf16 %v307_v27, %v306_v25  ;;  %v291_v30 = vld [vmem:[#allocation7 + $0xf8] sm:$0xff]  ;;  %v308_v32 = vld [vmem:[#allocation7 + $0x180] sm:$0xff]  ;;  %v309_v33 = vld [vmem:[#allocation7 + $0x188] sm:$0xff] }
  0x4d   :  { %603 = vmatpush1.bf16.msra.mxu1 %v602_v55  ;;  %576 = vmatprep.subr.bf16.mxu0 %v575_v57  ;;  %v591_v31 = vpack.c.bf16 %v291_v30, %v290_v29  ;;  %v274_v34 = vld [vmem:[#allocation7 + $0x70] sm:$0xff]  ;;  %v620_v35 = vpack.c.bf16 %v309_v33, %v308_v32  ;;  %v275_v36 = vld [vmem:[#allocation7 + $0x78] sm:$0xff]  ;;  %v230_v43 = vld [vmem:[%s857_s3] sm:$0xf] }
  0x4e   :  { %604 = vmatprep.subr.bf16.mxu1 %v744_v41  ;;  %v593_v38 = vpack.c.bf16 %v275_v36, %v274_v34  ;;  %v235_v47 = vrot.slane %v230_v43, %v234_v42  ;;  %v239_v48 = vrot.slane %v230_v43, %v238_v45  ;;  %v247_v49 = vrot.slane %v230_v43, %v246_v46  ;;  %v66_v52 = vld [vmem:[#allocation2 + $0x10] sm:$0xff]  ;;  %v65_v54 = vld [vmem:[#allocation2 + $0x8] sm:$0xff]  ;;  %v64_v56 = vld [vmem:[#allocation2] sm:$0xff] }
  0x4f   :  { %v67_v59 = vld [vmem:[#allocation2 + $0x18] sm:$0xff] }
  0x50   :  { %578 = vmatpush3.bf16.msra.mxu0 %v577_v63 }
  0x51   :  { %606 = vmatpush1.bf16.msra.mxu1 %v605_v0  ;;  %580 = vmatprep.subr.bf16.mxu0 %v579_v2  ;;  %v460_v2 = vld [vmem:[%s859_s5] sm:$0xff]  ;;  %s747_s5 = smov [#allocation8]  }
  0x52   :  { %607 = vmatprep.subr.bf16.mxu1 %v744_v41  ;;  %s498_s14 = sshll.u32 %s747_s5, 4  ;;  %s499_s14 = int_to_ptr.vmem [resolvable:$true] %s498_s14 }
  0x53   :  { %s708_s15 = scalar_lea.vmem %s499_s14, 128  ;;  %p713_p11 = scmp.lt.s32.totalorder %s499_s14, %s499_s14 }
  0x54   :  { %582 = vmatpush3.bf16.msra.mxu0 %v581_v8  ;;  %v462_v8 = vand.u32 127, %v232_v39  ;;  %p709_p10 = scmp.ne.s32.totalorder %s499_s14, %s708_s15  ;;  %p714_p12 = scmp.lt.s32.totalorder %s708_s15, %s708_s15 }
  0x55   :  { %609 = vmatpush1.bf16.msra.mxu1 %v608_v9  ;;  %584 = vmatprep.subr.bf16.mxu0 %v583_v11 }
  0x56   :  { %610 = vmatprep.subr.bf16.mxu1 %v744_v41  ;;  %p715_p13 = por %p714_p12, %p713_p11 }
  0x58   :  { %586 = vmatpush3.bf16.msra.mxu0 %v585_v17  ;;  %p716_p0 = pnand %p715_p13, %p709_p10 }
  0x59   :  { %612 = vmatpush1.bf16.msra.mxu1 %v611_v18  ;;  %588 = vmatprep.subr.bf16.mxu0 %v587_v19 }
  0x5a   :  { %613 = vmatprep.subr.bf16.mxu1 %v744_v41 }
  0x5c   :  { %590 = vmatpush3.bf16.msra.mxu0 %v589_v26 }
  0x5d   :  { %615 = vmatpush1.bf16.msra.mxu1 %v614_v22  ;;  %592 = vmatprep.subr.bf16.mxu0 %v591_v31 }
  0x5e   :  { %616 = vmatprep.subr.bf16.mxu1 %v744_v41 }
  0x60   :  { %594 = vmatpush3.bf16.msra.mxu0 %v593_v38 }
  0x61   :  { %618 = vmatpush1.bf16.msra.mxu1 %v617_v28 }
  0x62   :  { %619 = vmatprep.subr.bf16.mxu1 %v744_v41  ;;  %v243_v41 = vrot.slane %v230_v43, %v242_v44 }
  0x65   :  { %621 = vmatpush1.bf16.msra.mxu1 %v620_v35 }
 0x116   :  { %v154_v50 = vpop.f32.mrb[0].mxu0 }
 0x117   :  { %v252_v51 = vadd.f32 %v235_v47, %v154_v50  ;;  %v225_v53 = vpop.f32.mrb[0].mxu1  ;;  %v156_v55 = vpop.f32.mrb[1].mxu0 }
 0x118   :  { %v254_v57 = vadd.f32 %v243_v41, %v225_v53  ;;  %v253_v58 = vadd.f32 %v239_v48, %v156_v55  ;;  %v227_v60 = vpop.f32.mrb[1].mxu1 }
 0x119   :  { %v255_v61 = vadd.f32 %v247_v49, %v227_v60  ;;  %456 = vperm.xlu0 %634, %v227_v60   ;;  %v256_v0 = vmul.f32 %v252_v51, %v64_v56 }
 0x11a   :  { %v258_v62 = vmul.f32 %v254_v57, %v66_v52  ;;  %v257_v63 = vmul.f32 %v253_v58, %v65_v54 }
 0x11b   :  { %v259_v1 = vmul.f32 %v255_v61, %v67_v59 }
 0x11c   :  { %378 = vmatprep.mubr.f32.mxu0 %v257_v63 }
 0x11d   :  { %510 = vmatprep.mubr.msk.f32.mxu1 %vm310_vm1, %v259_v1  ;;  %379 = vmatmul.mubr.f32.vlgmr.msra.gmra.mrb[2].mxu0 %v256_v0 }
 0x11e   :  { %449 = vmatmul.mubr.f32.vlgmr.msra.gmra.mrb[2].mxu1 %v258_v62  ;;  %635 = vset.pattern.permute.xlu0 %v746_v3 }
 0x11f   :  { %464 = vperm.xlu0 %635, %v460_v2  }
 0x198   :  { %v457_v4 = vpop.permute.xlu0 %456 }
 0x19e   :  { %v465_v11 = vpop.permute.xlu0 %464 }
 0x19f   :  { %vm466_vm2 = vcmp.eq.s32.totalorder %v462_v8, %v465_v11 }
 0x1f0   :  { %v544_v5 = vpop.f32.mrb[2].mxu0 }
 0x1f1   :  { %v450_v6 = vpop.f32.mrb[2].mxu1  ;;  %v545_v7 = vpop.f32.mrb[3].mxu0 }
 0x1f2   :  { %v546_v9 = vadd.f32 %v545_v7, %v544_v5  ;;  %v452_v10 = vpop.f32.mrb[3].mxu1 }
 0x1f4   :  { %v451_v12 = vadd.f32 %v546_v9, %v450_v6 }
 0x1f6   :  { %v459_v13 = vadd.f32 %v457_v4, %v451_v12 }
 0x1f8   :  { %v467_v14 = vsel %vm466_vm2, %v459_v13, 0.0 }
 0x1f9   :  { %v469_v15 = vsel %vm468_vm3, %v467_v14, 0.0 }
 0x1fa   :  { %470 = vadd.xlane.f32.xlu1 %v469_v15 }
 0x287   :  { %v471_v16 = vpop.xlane.xlu1 %470 }
 0x288   :  { %v472_v17 = vsub.f32 %v471_v16, %v459_v13 }
 0x28a   :  { %v511_v18 = vmul.f32 -1.442695, %v472_v17 }
 0x28c   :  { %636 = vpow2.f32 %v511_v18 }
 0x296   :  { %v637_v19 = vpop.eup %636 }
 0x297   :  { %v476_v20 = vadd.f32 1.0, %v637_v19 }
 0x299   :  { %638 = vrcp.f32 %v476_v20 }
 0x2a3   :  { %v639_v21 = vpop.eup %638 }
 0x2a4   :  { %v479_v22 = vadd.f32 1e-06, %v639_v21 }
 0x2a6   :  { %640 = vlog2.f32 %v479_v22 }
 0x2b0   :  { %v641_v23 = vpop.eup %640 }
 0x2b1   :  { %v481_v24 = vmul.f32 0.6931472, %v641_v23 }
 0x2b3   :  { %v482_v25 = vsel %vm468_vm3, %v481_v24, 0.0 }
 0x2b4   :  { %483 = vadd.xlane.f32.xlu1 %v482_v25 }
 0x341   :  { %v484_v26 = vpop.xlane.xlu1 %483 }
 0x342   :  { %v486_v27 = vmul.f32 0.04, %v484_v26 }
 0x344   :  { %v487_v28 = vsub.f32 0.0, %v486_v27 }
 0x346   :  { %v488_v29 = vsel %vm468_vm3, %v459_v13, %v487_v28 }
 0x347   :  { %v490_v30 = vsel %vm489_vm4, %v488_v29, 0.0 }
 0x348   :  { %491 = vst [vmem:[#allocation8] sm:$0xff] %v490_v30 }
 0x349   :  { %719 = shalt.err (!%p716_p0)
}
 0x34a   :  { %s720_s18 = scalar_lea.hbm %s860_s6, 128 }
 0x34b   :  { %p721_p1 = scmp.ne.s32.totalorder %s860_s6, %s720_s18  ;;  %p724_p2 = scmp.lt.u32.totalorder %s720_s18, %s860_s6 }
 0x34d   :  { %p726_p3 = pnand %p724_p2, %p721_p1 }
 0x34f   :  { %729 = shalt.err (!%p726_p3)
}
 0x350   :  { %501 = dma.vmem_to_hbm [thread:$0]  %s499_s14, 128, %s860_s6, [#allocation4]  }
 0x351   :  { %734 = dma.done.wait [#allocation4], 128  }
 0x352   :  { %735 = vsyncadd [#allocation4], 4294967168 }
 0x353   :  { %505 = vsyncpa [#allocation3], 1 }
 0x354   :  { %506 = vsyncpa [#allocation6], 1 }
 0x355   :  { %507 = vsyncpa [#allocation4], 1 }

</bundles_post_ra>
